<compile_context>
chip_gen: v7x
topology: tpu7x:2x2x1
jax: 0.10.0
libtpu: 0.0.40
codegen_flags: <defaults>
</compile_context>

<pallas_src>
import functools

import jax
import jax.numpy as jnp
from jax.experimental import pallas as pl
from jax.experimental.pallas import tpu as pltpu


def _triplet_hinge_kernel(a_ref, p_ref, n_ref, o_ref, *, epsilon):
    a = a_ref[...]
    p = p_ref[...]
    n = n_ref[...]
    # Upcast only when inputs are not already f32 (mandatory for bf16 on v5e).
    if a.dtype != jnp.float32:
        a = a.astype(jnp.float32)
        p = p.astype(jnp.float32)
        n = n.astype(jnp.float32)

    d_ap = a - p
    d_an = a - n
    # Per-row Euclidean distances: reduce over the feature (lane) axis.
    dist1 = jnp.sqrt(jnp.sum(d_ap * d_ap, axis=1, keepdims=True))  # (TILE_B, 1)
    dist2 = jnp.sqrt(jnp.sum(d_an * d_an, axis=1, keepdims=True))  # (TILE_B, 1)

    # Per-row hinge; mean over the true batch happens in the wrapper.
    o_ref[...] = jnp.maximum(jnp.float32(epsilon) + dist1 - dist2, 0.0)


def triplet_loss(anchor, positive, negative, epsilon=1.0, *, tile_b=None):
    """Pallas TPU implementation of TripletLoss.forward.

    anchor/positive/negative: (B, D) arrays. Returns a scalar (f32).
    """
    assert anchor.shape == positive.shape == negative.shape
    assert anchor.dtype == positive.dtype == negative.dtype
    B, D = anchor.shape
    itemsize = jnp.dtype(anchor.dtype).itemsize

    # --- Choose TILE_B: 3 inputs x 2 pipeline buffers must fit the VMEM budget.
    vmem_budget_bytes = 32 * 1024 * 1024
    bytes_per_row = 3 * 2 * D * itemsize
    max_tile = max(8, (vmem_budget_bytes // bytes_per_row) // 8 * 8)
    b_rounded = ((B + 7) // 8) * 8  # at least a multiple of 8 (sublane rule)
    if tile_b is None:
        tile_b = int(min(max_tile, b_rounded))
    assert tile_b % 8 == 0 and tile_b > 0

    num_tiles = pl.cdiv(B, tile_b)
    b_padded = num_tiles * tile_b
    pad = b_padded - B
    if pad:
        pad_cfg = ((0, pad), (0, 0))
        anchor = jnp.pad(anchor, pad_cfg)
        positive = jnp.pad(positive, pad_cfg)
        negative = jnp.pad(negative, pad_cfg)

    kernel = functools.partial(_triplet_hinge_kernel, epsilon=float(epsilon))

    in_spec = pl.BlockSpec((tile_b, D), lambda i: (i, 0))
    hinges = pl.pallas_call(
        kernel,
        out_shape=jax.ShapeDtypeStruct((b_padded, 1), jnp.float32),
        grid=(num_tiles,),
        in_specs=[in_spec, in_spec, in_spec],
        out_specs=pl.BlockSpec((tile_b, 1), lambda i: (i, 0)),
        compiler_params=pltpu.CompilerParams(
            dimension_semantics=("parallel",),
            vmem_limit_bytes=48 * 1024 * 1024,
        ),
        cost_estimate=pl.CostEstimate(
            flops=int(6 * b_padded * D),
            transcendentals=int(2 * b_padded),
            bytes_accessed=int(3 * b_padded * D * itemsize + b_padded * 4),
        ),
    )(anchor, positive, negative)

    # Final reduction over the true batch only (padded rows dropped).
    return jnp.sum(hinges[:B, 0]) / jnp.float32(B)


def _reference_triplet_loss(anchor, positive, negative, epsilon=1.0):
    a = anchor.astype(jnp.float32)
    p = positive.astype(jnp.float32)
    n = negative.astype(jnp.float32)
    d1 = jnp.sqrt(jnp.sum((a - p) ** 2, axis=1))
    d2 = jnp.sqrt(jnp.sum((a - n) ** 2, axis=1))
    return jnp.mean(jnp.maximum(epsilon + d1 - d2, 0.0))


if __name__ == "__main__":
    key = jax.random.PRNGKey(0)

    # Test 1: small aligned case (batch=8, hidden=32), single tile.
    k_a, k_p, k_n = jax.random.split(key, 3)
    B, D = 8, 32
    anchor = jax.random.normal(k_a, (B, D), dtype=jnp.float32)
    positive = jax.random.normal(k_p, (B, D), dtype=jnp.float32)
    negative = jax.random.normal(k_n, (B, D), dtype=jnp.float32)

    loss = triplet_loss(anchor, positive, negative, epsilon=1.0)
    jax.block_until_ready(loss)
    ref = _reference_triplet_loss(anchor, positive, negative, epsilon=1.0)
    assert jnp.allclose(loss, ref, atol=1e-5, rtol=1e-5), (loss, ref)

    # Test 2: ragged batch + multi-tile grid (forces padding and pipelining).
    k_a2, k_p2, k_n2 = jax.random.split(jax.random.PRNGKey(1), 3)
    B2, D2 = 13, 32
    a2 = jax.random.normal(k_a2, (B2, D2), dtype=jnp.float32)
    p2 = jax.random.normal(k_p2, (B2, D2), dtype=jnp.float32)
    n2 = jax.random.normal(k_n2, (B2, D2), dtype=jnp.float32)

    loss2 = triplet_loss(a2, p2, n2, epsilon=0.5, tile_b=8)
    jax.block_until_ready(loss2)
    ref2 = _reference_triplet_loss(a2, p2, n2, epsilon=0.5)
    assert jnp.allclose(loss2, ref2, atol=1e-5, rtol=1e-5), (loss2, ref2)

    print("KERNEL_OK")
</pallas_src>

<mosaic_0001>
module attributes {stable_mosaic.version = 11 : i64} {
  func.func @_triplet_hinge_kernel(%arg0: i32, %arg1: memref<8x32xf32, #tpu.memory_space<vmem>>, %arg2: memref<8x32xf32, #tpu.memory_space<vmem>>, %arg3: memref<8x32xf32, #tpu.memory_space<vmem>>, %arg4: memref<8x1xf32, #tpu.memory_space<vmem>>) attributes {dimension_semantics = [#tpu.dimension_semantics<parallel>], iteration_bounds = array<i64: 1>, scalar_prefetch = 0 : i64, scratch_operands = 0 : i64, tpu.core_type = #tpu.core_type<tc>, window_params = [{transform_indices = @transform_0, window_bounds = array<i64: 8, 32>}, {transform_indices = @transform_1, window_bounds = array<i64: 8, 32>}, {transform_indices = @transform_2, window_bounds = array<i64: 8, 32>}, {transform_indices = @transform_3, window_bounds = array<i64: 8, 1>}]} {
    %c0 = arith.constant 0 : index
    %c0_0 = arith.constant 0 : index
    %0 = vector.load %arg1[%c0, %c0_0] : memref<8x32xf32, #tpu.memory_space<vmem>>, vector<8x32xf32>
    %c0_1 = arith.constant 0 : index
    %c0_2 = arith.constant 0 : index
    %1 = vector.load %arg2[%c0_1, %c0_2] : memref<8x32xf32, #tpu.memory_space<vmem>>, vector<8x32xf32>
    %c0_3 = arith.constant 0 : index
    %c0_4 = arith.constant 0 : index
    %2 = vector.load %arg3[%c0_3, %c0_4] : memref<8x32xf32, #tpu.memory_space<vmem>>, vector<8x32xf32>
    %3 = arith.subf %0, %1 : vector<8x32xf32>
    %4 = arith.subf %0, %2 : vector<8x32xf32>
    %5 = arith.mulf %3, %3 : vector<8x32xf32>
    %cst = arith.constant dense<0.000000e+00> : vector<8xf32>
    %6 = vector.multi_reduction <add>, %5, %cst [1] : vector<8x32xf32> to vector<8xf32>
    %7 = vector.shape_cast %6 : vector<8xf32> to vector<8x1xf32>
    %8 = math.sqrt %7 : vector<8x1xf32>
    %9 = arith.mulf %4, %4 : vector<8x32xf32>
    %cst_5 = arith.constant dense<0.000000e+00> : vector<8xf32>
    %10 = vector.multi_reduction <add>, %9, %cst_5 [1] : vector<8x32xf32> to vector<8xf32>
    %11 = vector.shape_cast %10 : vector<8xf32> to vector<8x1xf32>
    %12 = math.sqrt %11 : vector<8x1xf32>
    %cst_6 = arith.constant 1.000000e+00 : f32
    %13 = vector.broadcast %cst_6 : f32 to vector<8x1xf32>
    %14 = arith.addf %13, %8 : vector<8x1xf32>
    %15 = arith.subf %14, %12 : vector<8x1xf32>
    %cst_7 = arith.constant 0.000000e+00 : f32
    %16 = vector.broadcast %cst_7 : f32 to vector<8x1xf32>
    %17 = arith.maximumf %15, %16 : vector<8x1xf32>
    %c0_8 = arith.constant 0 : index
    %c0_9 = arith.constant 0 : index
    %18 = vector.load %arg4[%c0_8, %c0_9] : memref<8x1xf32, #tpu.memory_space<vmem>>, vector<8x1xf32>
    tpu.vector_store %arg4[%c0_8, %c0_9], %17 {strides = array<i32>} : memref<8x1xf32, #tpu.memory_space<vmem>>, vector<8x1xf32>,
    return
  }
  func.func @transform_0(%arg0: i32) -> (i32, i32) {
    %c0_i32 = arith.constant 0 : i32
    %c0_i32_0 = arith.constant 0 : i32
    return %arg0, %c0_i32 : i32, i32
  }
  func.func @transform_1(%arg0: i32) -> (i32, i32) {
    %c0_i32 = arith.constant 0 : i32
    %c0_i32_0 = arith.constant 0 : i32
    return %arg0, %c0_i32 : i32, i32
  }
  func.func @transform_2(%arg0: i32) -> (i32, i32) {
    %c0_i32 = arith.constant 0 : i32
    %c0_i32_0 = arith.constant 0 : i32
    return %arg0, %c0_i32 : i32, i32
  }
  func.func @transform_3(%arg0: i32) -> (i32, i32) {
    %c0_i32 = arith.constant 0 : i32
    %c0_i32_0 = arith.constant 0 : i32
    return %arg0, %c0_i32 : i32, i32
  }
}

</mosaic_0001>

<bundles_post_ra>
// kernel: tpu_custom_call.1
= control target key start
LH: loop header
LB: loop body
LE: loop exit
PB: predicated region body
PF: predicated region fallthrough
CT: control target
= control target key end

     0   :  { %8 = vsyncpa [#allocation3], 0  ;;  %s227_s0 = inlined_call_operand.hbm [shape: f32[8,32], index: 0, kind: input, shape index: {}]   ;;  %s228_s1 = inlined_call_operand.hbm [shape: f32[8,32], index: 1, kind: input, shape index: {}]   ;;  %s229_s2 = inlined_call_operand.hbm [shape: f32[8,32], index: 2, kind: input, shape index: {}]   ;;  %s230_s3 = inlined_call_operand.vmem [shape: f32[8,1], index: 3, kind: output, shape index: {}]  }
   0x1   :  { %9 = vsyncpa [#allocation5], 0  ;;  %s165_s12 = smov [#allocation4]   ;;  %s166_s14 = smov [#allocation2]  }
   0x2   :  { %s26_s13 = sshll.u32 %s165_s12, 4  ;;  %s16_s15 = sshll.u32 %s166_s14, 4  ;;  %s27_s13 = int_to_ptr.vmem [resolvable:$true] %s26_s13  ;;  %s17_s15 = int_to_ptr.vmem [resolvable:$true] %s16_s15 }
   0x3   :  { %s95_s18 = scalar_lea.hbm %s228_s1, 128 }
   0x4   :  { %p96_p0 = scmp.ne.s32.totalorder %s228_s1, %s95_s18  ;;  %p99_p1 = scmp.lt.u32.totalorder %s95_s18, %s228_s1 }
   0x6   :  { %p101_p2 = pnand %p99_p1, %p96_p0 }
   0x8   :  { %104 = shalt.err (!%p101_p2)
}
   0x9   :  { %s105_s23 = scalar_lea.vmem %s27_s13, 128  ;;  %p110_p4 = scmp.lt.s32.totalorder %s27_s13, %s27_s13 }
   0xa   :  { %p106_p3 = scmp.ne.s32.totalorder %s27_s13, %s105_s23  ;;  %p111_p5 = scmp.lt.s32.totalorder %s105_s23, %s105_s23 }
   0xc   :  { %p112_p6 = por %p111_p5, %p110_p4 }
   0xe   :  { %p113_p7 = pnand %p112_p6, %p106_p3 }
  0x10   :  { %116 = shalt.err (!%p113_p7)
}
  0x11   :  { %29 = dma.hbm_to_vmem [thread:$0]  %s228_s1, 128, %s27_s13, [#allocation5]  }
  0x12   :  { %s117_s28 = scalar_lea.hbm %s227_s0, 128 }
  0x13   :  { %p118_p8 = scmp.ne.s32.totalorder %s227_s0, %s117_s28  ;;  %p121_p9 = scmp.lt.u32.totalorder %s117_s28, %s227_s0 }
  0x15   :  { %p123_p10 = pnand %p121_p9, %p118_p8 }
  0x17   :  { %126 = shalt.err (!%p123_p10)
}
  0x18   :  { %s127_s6 = scalar_lea.vmem %s17_s15, 128  ;;  %p132_p12 = scmp.lt.s32.totalorder %s17_s15, %s17_s15 }
  0x19   :  { %p128_p11 = scmp.ne.s32.totalorder %s17_s15, %s127_s6  ;;  %p133_p13 = scmp.lt.s32.totalorder %s127_s6, %s127_s6 }
  0x1b   :  { %p134_p0 = por %p133_p13, %p132_p12 }
  0x1d   :  { %p135_p1 = pnand %p134_p0, %p128_p11 }
  0x1f   :  { %138 = shalt.err (!%p135_p1)
}
  0x20   :  { %19 = dma.hbm_to_vmem [thread:$0]  %s227_s0, 128, %s17_s15, [#allocation3]  }
  0x21   :  { %s167_s8 = smov [#allocation6]   ;;  %s139_s12 = scalar_lea.hbm %s229_s2, 128 }
  0x22   :  { %s36_s9 = sshll.u32 %s167_s8, 4  ;;  %p140_p2 = scmp.ne.s32.totalorder %s229_s2, %s139_s12  ;;  %s37_s9 = int_to_ptr.vmem [resolvable:$true] %s36_s9 }
  0x23   :  { %p143_p3 = scmp.lt.u32.totalorder %s139_s12, %s229_s2 }
  0x25   :  { %p145_p4 = pnand %p143_p3, %p140_p2 }
  0x27   :  { %148 = shalt.err (!%p145_p4)
}
  0x28   :  { %s149_s18 = scalar_lea.vmem %s37_s9, 128  ;;  %p154_p6 = scmp.lt.s32.totalorder %s37_s9, %s37_s9 }
  0x29   :  { %p150_p5 = scmp.ne.s32.totalorder %s37_s9, %s149_s18  ;;  %p155_p7 = scmp.lt.s32.totalorder %s149_s18, %s149_s18 }
  0x2b   :  { %p156_p8 = por %p155_p7, %p154_p6 }
  0x2d   :  { %p157_p9 = pnand %p156_p8, %p150_p5 }
  0x2f   :  { %160 = shalt.err (!%p157_p9)
}
  0x30   :  { %39 = dma.hbm_to_vmem [thread:$0]  %s229_s2, 128, %s37_s9, [#allocation5]  }
  0x31   :  { %161 = dma.done.wait [#allocation3], 128  }
  0x32   :  { %162 = vsyncadd [#allocation3], 4294967168 }
  0x33   :  { %163 = dma.done.wait [#allocation5], 256  }
  0x34   :  { %164 = vsyncadd [#allocation5], 4294967040  ;;  %v49_v0 = vld [vmem:[#allocation2] sm:$0xff]  ;;  %v50_v1 = vld [vmem:[#allocation4] sm:$0xff]  ;;  %vm55_vm0 = vcmask 261120   ;;  %vm80_vm5 = vcmask 7168  }
  0x35   :  { %v51_v2 = vld [vmem:[#allocation6] sm:$0xff]  ;;  %v52_v3 = vsub.f32 %v49_v0, %v50_v1 }
  0x36   :  { %v53_v4 = vsub.f32 %v49_v0, %v51_v2 }
  0x37   :  { %v54_v5 = vmul.f32 %v52_v3, %v52_v3 }
  0x38   :  { %v66_v6 = vmul.f32 %v53_v4, %v53_v4 }
  0x39   :  { %v56_v7 = vsel %vm55_vm0, %v54_v5, 0.0 }
  0x3a   :  { %57 = vadd.xlane.f32.xlu0 %v56_v7  ;;  %v67_v8 = vsel %vm55_vm0, %v66_v6, 0.0 }
  0x3e   :  { %68 = vadd.xlane.f32.xlu0 %v67_v8 }
  0xc7   :  { %v58_v9 = vpop.xlane.xlu0 %57 }
  0xc8   :  { %91 = vrsqrt.f32 %v58_v9  ;;  %vm61_vm1 = vcmp.eq.f32.partialorder %v58_v9, inf  ;;  %v64_v13 = vand.u32 2147483648, %v58_v9  ;;  %vm63_vm2 = vcmp.eq.f32.partialorder %v58_v9, 0.0 }
  0xcb   :  { %v69_v10 = vpop.xlane.xlu0 %68 }
  0xcc   :  { %93 = vrsqrt.f32 %v69_v10  ;;  %vm72_vm3 = vcmp.eq.f32.partialorder %v69_v10, inf  ;;  %v75_v18 = vand.u32 2147483648, %v69_v10  ;;  %vm74_vm4 = vcmp.eq.f32.partialorder %v69_v10, 0.0 }
  0xd2   :  { %v92_v11 = vpop.eup %91 }
  0xd3   :  { %v60_v12 = vmul.f32 %v92_v11, %v58_v9 }
  0xd5   :  { %v62_v14 = vsel %vm61_vm1, %v58_v9, %v60_v12 }
  0xd6   :  { %v94_v15 = vpop.eup %93  ;;  %v65_v16 = vsel %vm63_vm2, %v64_v13, %v62_v14 }
  0xd7   :  { %v71_v17 = vmul.f32 %v94_v15, %v69_v10  ;;  %v77_v19 = vadd.f32 1.0, %v65_v16 }
  0xd9   :  { %v73_v20 = vsel %vm72_vm3, %v69_v10, %v71_v17 }
  0xda   :  { %v76_v21 = vsel %vm74_vm4, %v75_v18, %v73_v20 }
  0xdb   :  { %v78_v22 = vsub.f32 %v77_v19, %v76_v21 }
  0xdd   :  { %v79_v23 = vmax.f32 %v78_v22, 0.0 }
  0xdf   :  { %81 = vst.msk [vmem:[%s230_s3] sm:$0xff] %vm80_vm5, %v79_v23 }
  0xe0   :  { %86 = vsyncpa [#allocation3], 1 }
  0xe1   :  { %87 = vsyncpa [#allocation5], 1 }

</bundles_post_ra>
